<compile_context>
chip_gen: v6e
topology: v6e:2x2x1
jax: 0.10.0
libtpu: 0.0.40
codegen_flags: <defaults>
</compile_context>

<pallas_src>
import functools

import jax
import jax.numpy as jnp
import numpy as np
from jax import lax
from jax.experimental import pallas as pl
from jax.experimental.pallas import tpu as pltpu


def _deephit_kernel(phi_ref, dur_col_ref, dur_row_ref, ev_col_ref, ev_row_ref,
                    out_ref, *, alpha: float, sigma: float, epsilon: float):
    phi = phi_ref[...]            # [B, Tp] f32 (already pad_col'ed)
    dur_c = dur_col_ref[...]      # [B, 1] i32
    dur_r = dur_row_ref[...]      # [1, B] i32
    ev_c = ev_col_ref[...]        # [B, 1] f32
    ev_r = ev_row_ref[...]        # [1, B] f32
    B, Tp = phi.shape

    # One-hot of the duration index in both orientations (pure VPU iota+cmp).
    # y  [B,Tp]: y[i,t]  = 1{t == dur_i}   -> masked gathers for the NLL.
    # yT [Tp,B]: yT[t,j] = 1{t == dur_j}   -> native [B,Tp]x[Tp,B] MXU feed
    #                                         for rmat (no XLU transpose).
    y = (lax.broadcasted_iota(jnp.int32, (B, Tp), 1) == dur_c).astype(jnp.float32)
    yT = (lax.broadcasted_iota(jnp.int32, (Tp, B), 0) == dur_r).astype(jnp.float32)

    # ---------------- nll_pmf ----------------
    gamma = jnp.max(phi, axis=1, keepdims=True)                      # [B, 1]
    e = jnp.exp(phi - gamma)                                         # [B, Tp]
    sum_ = jnp.sum(e, axis=1, keepdims=True)                         # [B, 1]

    # Cumulative sum along lanes as a matmul with upper-triangular ones (MXU).
    # Kept in f32: log(sum_ - cum_g) below is a near-cancellation.
    r_i = lax.broadcasted_iota(jnp.int32, (Tp, Tp), 0)
    c_i = lax.broadcasted_iota(jnp.int32, (Tp, Tp), 1)
    tri = (r_i <= c_i).astype(jnp.float32)                           # tri[s,t]=1{s<=t}
    cum = jnp.dot(e, tri, preferred_element_type=jnp.float32)        # [B, Tp]

    phi_g = jnp.sum(phi * y, axis=1, keepdims=True)                  # phi.gather(1, idx)
    cum_g = jnp.sum(cum * y, axis=1, keepdims=True)                  # cumsum.gather(1, idx)

    part1 = (phi_g - gamma) * ev_c
    part2 = -jnp.log(jnp.maximum(sum_, 0.0) + epsilon)
    part3 = jnp.log(jnp.maximum(sum_ - cum_g, 0.0) + epsilon) * (1.0 - ev_c)
    nll = jnp.mean(-(part1 + part2 + part3))                         # reduction='mean'

    # ---------------- rank_loss_deephit_single ----------------
    # pmf = softmax(pad_col(phi)); F = cumsum(pmf) = cum / sum_
    recip_sum = pl.reciprocal(sum_, approx=False)                    # exact (feeds exp)
    F = cum * recip_sum                                              # [B, Tp]

    # rmat[i,j] = F_i(T_j) : native MXU matmul, yT built above (no transpose).
    rmat = jnp.dot(F, yT, preferred_element_type=jnp.float32)        # [B, B]

    # r_jj = F_j(T_j) = cum_g[j]/sum_[j] -- already computed for the NLL.
    # Single tiny [B,1]->[1,B] transpose; independent of the rmat matmul.
    diag_row = jnp.transpose(cum_g * recip_sum, (1, 0))              # [1, B]

    # rank_mat^T[a,b] = rank_mat[b,a]
    #   = 1{ ev_b != 0 and ( dur_b < dur_a or (dur_b == dur_a and ev_a == 0) ) }
    # (Full-matrix mean is transpose invariant, so pairing rank_mat^T with
    #  R^T = diag_row - rmat avoids transposing any BxB matrix.)
    rank_mask = ((ev_r != 0.0)
                 & ((dur_r < dur_c) | ((dur_r == dur_c) & (ev_c == 0.0)))
                 ).astype(jnp.float32)                               # [B, B]

    inv_sigma = 1.0 / sigma          # trace-time constant; -R/sigma folded in
    rank_loss = jnp.mean(rank_mask * jnp.exp((rmat - diag_row) * inv_sigma))

    out_ref[0, 0] = alpha * nll + (1.0 - alpha) * rank_loss


def deephit_single_loss(phi, idx_durations, events, *, alpha=0.5, sigma=0.1,
                        epsilon=1e-7):
    """Pallas implementation of DeepHitSingleLoss.forward (reduction='mean')."""
    B, T = phi.shape
    Tp = T + 1

    # forward(): idx_durations = int64(t / 6); exact integer truncation for
    # non-negative durations (no f32 rounding), matching torch semantics.
    dur = jnp.asarray(idx_durations).astype(jnp.int32) // 6
    # TODO(synk): no in-kernel guard that dur < T+1 (torch .gather would raise);
    # out-of-range indices yield an all-zero one-hot row instead of an error.

    # pad_col: append a zero column
    phi_pad = jnp.concatenate(
        [phi.astype(jnp.float32), jnp.zeros((B, 1), jnp.float32)], axis=1)
    ev = jnp.asarray(events).astype(jnp.float32).reshape(-1)

    kernel = functools.partial(_deephit_kernel, alpha=float(alpha),
                               sigma=float(sigma), epsilon=float(epsilon))

    # VMEM footprint: a handful of [B,Tp] temps, tri [Tp,Tp], yT [Tp,B],
    # ~3 [B,B] temps; x2 headroom, clamped to [16 MiB, 64 MiB] (v7x-safe).
    fp32 = 4
    footprint = 2 * fp32 * (8 * B * Tp + Tp * Tp + Tp * B + 4 * B * B)
    vmem_limit = int(min(max(footprint, 16 * 1024 * 1024), 64 * 1024 * 1024))

    cost = pl.CostEstimate(
        flops=2 * B * Tp * Tp + 2 * B * Tp * B + 12 * B * Tp + 6 * B * B,
        transcendentals=B * Tp + B * B + 2 * B,
        bytes_accessed=fp32 * (B * Tp + 4 * B + 1),
    )

    # NOTE: for B >~ 512 the BxB rank-term temporaries should be row-tiled over
    # a "parallel" batch grid (v7x: 64 MiB VMEM, 2 TCs); single block suffices
    # at small B and keeps the diagonal computation one-pass.
    out = pl.pallas_call(
        kernel,
        out_shape=jax.ShapeDtypeStruct((1, 1), jnp.float32),
        in_specs=[pl.BlockSpec(memory_space=pltpu.MemorySpace.VMEM)] * 5,
        out_specs=pl.BlockSpec(memory_space=pltpu.MemorySpace.SMEM),
        compiler_params=pltpu.CompilerParams(vmem_limit_bytes=vmem_limit),
        cost_estimate=cost,
    )(phi_pad, dur.reshape(B, 1), dur.reshape(1, B),
      ev.reshape(B, 1), ev.reshape(1, B))
    return out[0, 0]


def _reference_loss(phi, idx_durations, events, alpha=0.5, sigma=0.1, eps=1e-7):
    """Pure-numpy mirror of the torch module, for verification."""
    phi = np.asarray(phi, np.float32)
    dur = np.asarray(idx_durations, np.int64) // 6
    ev = np.asarray(events, np.float32).reshape(-1)
    B, T = phi.shape
    phi_p = np.concatenate([phi, np.zeros((B, 1), np.float32)], axis=1)
    # nll_pmf
    gamma = phi_p.max(1)
    cumsum = np.cumsum(np.exp(phi_p - gamma[:, None]), axis=1)
    sum_ = cumsum[:, -1]
    part1 = (phi_p[np.arange(B), dur] - gamma) * ev
    part2 = -np.log(np.maximum(sum_, 0) + eps)
    part3 = np.log(np.maximum(sum_ - cumsum[np.arange(B), dur], 0) + eps) * (1 - ev)
    nll = np.mean(-(part1 + part2 + part3))
    # rank loss
    pmf = np.exp(phi_p - gamma[:, None]) / sum_[:, None]
    y = np.zeros_like(pmf)
    y[np.arange(B), dur] = 1.0
    r = np.cumsum(pmf, axis=1) @ y.T
    R = (np.ones((B, 1)) @ np.diag(r)[None, :] - r).T
    rank_mat = np.zeros((B, B), np.float32)
    for i in range(B):
        if ev[i] == 0:
            continue
        for j in range(B):
            if dur[i] < dur[j] or (dur[i] == dur[j] and ev[j] == 0):
                rank_mat[i, j] = 1.0
    rank_loss = np.mean(np.mean(rank_mat * np.exp(-R / sigma), axis=1))
    return alpha * nll + (1 - alpha) * rank_loss


if __name__ == "__main__":
    B, T = 8, 15  # phi: [batch, n_durations]; padded to T+1 = 16 inside wrapper
    key = jax.random.PRNGKey(0)
    k1, k2, k3 = jax.random.split(key, 3)
    phi = jax.random.normal(k1, (B, T), dtype=jnp.float32)
    # raw durations; forward divides by 6 -> indices in [0, T)
    idx_durations = jax.random.randint(k2, (B,), 0, 6 * T, dtype=jnp.int32)
    events = jax.random.bernoulli(k3, 0.6, (B,)).astype(jnp.float32)

    loss = jax.jit(deephit_single_loss)(phi, idx_durations, events)
    loss = jax.block_until_ready(loss)

    ref = _reference_loss(np.array(phi), np.array(idx_durations), np.array(events))
    np.testing.assert_allclose(np.array(loss), ref, rtol=1e-5, atol=1e-5)
    print("KERNEL_OK")
</pallas_src>

<mosaic_0001>
module attributes {stable_mosaic.version = 11 : i64} {
  func.func @_deephit_kernel(%arg0: memref<8x16xf32, #tpu.memory_space<vmem>>, %arg1: memref<8x1xi32, #tpu.memory_space<vmem>>, %arg2: memref<1x8xi32, #tpu.memory_space<vmem>>, %arg3: memref<8x1xf32, #tpu.memory_space<vmem>>, %arg4: memref<1x8xf32, #tpu.memory_space<vmem>>, %arg5: memref<1x1xf32, #tpu.memory_space<smem>>) attributes {dimension_semantics = [], scalar_prefetch = 0 : i64, scratch_operands = 0 : i64, tpu.core_type = #tpu.core_type<tc>} {
    %c0 = arith.constant 0 : index
    %c0_0 = arith.constant 0 : index
    %0 = vector.load %arg0[%c0, %c0_0] : memref<8x16xf32, #tpu.memory_space<vmem>>, vector<8x16xf32>
    %c0_1 = arith.constant 0 : index
    %c0_2 = arith.constant 0 : index
    %1 = vector.load %arg1[%c0_1, %c0_2] : memref<8x1xi32, #tpu.memory_space<vmem>>, vector<8x1xi32>
    %c0_3 = arith.constant 0 : index
    %c0_4 = arith.constant 0 : index
    %2 = vector.load %arg2[%c0_3, %c0_4] : memref<1x8xi32, #tpu.memory_space<vmem>>, vector<1x8xi32>
    %c0_5 = arith.constant 0 : index
    %c0_6 = arith.constant 0 : index
    %3 = vector.load %arg3[%c0_5, %c0_6] : memref<8x1xf32, #tpu.memory_space<vmem>>, vector<8x1xf32>
    %c0_7 = arith.constant 0 : index
    %c0_8 = arith.constant 0 : index
    %4 = vector.load %arg4[%c0_7, %c0_8] : memref<1x8xf32, #tpu.memory_space<vmem>>, vector<1x8xf32>
    %5 = tpu.iota {dimensions = array<i32: 1>} : vector<8x16xi32>
    %6 = vector.broadcast %1 : vector<8x1xi32> to vector<8x16xi32>
    %7 = arith.cmpi eq, %5, %6 : vector<8x16xi32>
    %8 = arith.extui %7 : vector<8x16xi1> to vector<8x16xi32>
    %9 = arith.sitofp %8 : vector<8x16xi32> to vector<8x16xf32>
    %10 = tpu.iota {dimensions = array<i32: 0>} : vector<16x8xi32>
    %11 = vector.broadcast %2 : vector<1x8xi32> to vector<16x8xi32>
    %12 = arith.cmpi eq, %10, %11 : vector<16x8xi32>
    %13 = arith.extui %12 : vector<16x8xi1> to vector<16x8xi32>
    %14 = arith.sitofp %13 : vector<16x8xi32> to vector<16x8xf32>
    %cst = arith.constant dense<0xFF800000> : vector<8xf32>
    %15 = vector.multi_reduction <maximumf>, %0, %cst [1] : vector<8x16xf32> to vector<8xf32>
    %16 = vector.shape_cast %15 : vector<8xf32> to vector<8x1xf32>
    %17 = vector.broadcast %16 : vector<8x1xf32> to vector<8x16xf32>
    %18 = arith.subf %0, %17 : vector<8x16xf32>
    %19 = math.exp %18 : vector<8x16xf32>
    %cst_9 = arith.constant dense<0.000000e+00> : vector<8xf32>
    %20 = vector.multi_reduction <add>, %19, %cst_9 [1] : vector<8x16xf32> to vector<8xf32>
    %21 = vector.shape_cast %20 : vector<8xf32> to vector<8x1xf32>
    %22 = tpu.iota {dimensions = array<i32: 0>} : vector<16x16xi32>
    %23 = tpu.iota {dimensions = array<i32: 1>} : vector<16x16xi32>
    %24 = arith.cmpi sle, %22, %23 : vector<16x16xi32>
    %25 = arith.extui %24 : vector<16x16xi1> to vector<16x16xi32>
    %26 = arith.sitofp %25 : vector<16x16xi32> to vector<16x16xf32>
    %cst_10 = arith.constant dense<0.000000e+00> : vector<8x16xf32>
    %27 = tpu.matmul %19, %26, %cst_10 {dimension_numbers = #tpu.dot_dimension_numbers<[1], [0], [0], [1], [0, 0, 1, 1], [], []>} : vector<8x16xf32>, vector<16x16xf32>, vector<8x16xf32> -> vector<8x16xf32>
    %28 = arith.mulf %0, %9 : vector<8x16xf32>
    %cst_11 = arith.constant dense<0.000000e+00> : vector<8xf32>
    %29 = vector.multi_reduction <add>, %28, %cst_11 [1] : vector<8x16xf32> to vector<8xf32>
    %30 = vector.shape_cast %29 : vector<8xf32> to vector<8x1xf32>
    %31 = arith.mulf %27, %9 : vector<8x16xf32>
    %cst_12 = arith.constant dense<0.000000e+00> : vector<8xf32>
    %32 = vector.multi_reduction <add>, %31, %cst_12 [1] : vector<8x16xf32> to vector<8xf32>
    %33 = vector.shape_cast %32 : vector<8xf32> to vector<8x1xf32>
    %34 = arith.subf %30, %16 : vector<8x1xf32>
    %35 = arith.mulf %34, %3 : vector<8x1xf32>
    %cst_13 = arith.constant 0.000000e+00 : f32
    %36 = vector.broadcast %cst_13 : f32 to vector<8x1xf32>
    %37 = arith.maximumf %21, %36 : vector<8x1xf32>
    %cst_14 = arith.constant 1.000000e-07 : f32
    %38 = vector.broadcast %cst_14 : f32 to vector<8x1xf32>
    %39 = arith.addf %37, %38 : vector<8x1xf32>
    %40 = math.log %39 : vector<8x1xf32>
    %cst_15 = arith.constant 0.000000e+00 : f32
    %41 = vector.broadcast %cst_15 : f32 to vector<8x1xf32>
    %42 = arith.subf %41, %40 : vector<8x1xf32>
    %43 = arith.subf %21, %33 : vector<8x1xf32>
    %cst_16 = arith.constant 0.000000e+00 : f32
    %44 = vector.broadcast %cst_16 : f32 to vector<8x1xf32>
    %45 = arith.maximumf %43, %44 : vector<8x1xf32>
    %cst_17 = arith.constant 1.000000e-07 : f32
    %46 = vector.broadcast %cst_17 : f32 to vector<8x1xf32>
    %47 = arith.addf %45, %46 : vector<8x1xf32>
    %48 = math.log %47 : vector<8x1xf32>
    %cst_18 = arith.constant 1.000000e+00 : f32
    %49 = vector.broadcast %cst_18 : f32 to vector<8x1xf32>
    %50 = arith.subf %49, %3 : vector<8x1xf32>
    %51 = arith.mulf %48, %50 : vector<8x1xf32>
    %52 = arith.addf %35, %42 : vector<8x1xf32>
    %53 = arith.addf %52, %51 : vector<8x1xf32>
    %cst_19 = arith.constant 0.000000e+00 : f32
    %54 = vector.broadcast %cst_19 : f32 to vector<8x1xf32>
    %55 = arith.subf %54, %53 : vector<8x1xf32>
    %56 = vector.shape_cast %55 : vector<8x1xf32> to vector<1x8x1xf32>
    %cst_20 = arith.constant dense<0.000000e+00> : vector<1xf32>
    %57 = vector.multi_reduction <add>, %56, %cst_20 [1, 2] : vector<1x8x1xf32> to vector<1xf32>
    %58 = vector.shape_cast %57 : vector<1xf32> to vector<1x1x1xf32>
    %59 = vector.extract %58[0, 0, 0] : f32 from vector<1x1x1xf32>
    %cst_21 = arith.constant 8.000000e+00 : f32
    %60 = arith.divf %59, %cst_21 : f32
    %61 = tpu.reciprocal %21 : vector<8x1xf32> -> vector<8x1xf32>
    %62 = vector.broadcast %61 : vector<8x1xf32> to vector<8x16xf32>
    %63 = arith.mulf %27, %62 : vector<8x16xf32>
    %cst_22 = arith.constant dense<0.000000e+00> : vector<8x8xf32>
    %64 = tpu.matmul %63, %14, %cst_22 {dimension_numbers = #tpu.dot_dimension_numbers<[1], [0], [0], [1], [0, 0, 1, 1], [], []>} : vector<8x16xf32>, vector<16x8xf32>, vector<8x8xf32> -> vector<8x8xf32>
    %65 = arith.mulf %33, %61 : vector<8x1xf32>
    %66 = tpu.transpose %65, [1, 0] : vector<8x1xf32> -> vector<1x8xf32>
    %cst_23 = arith.constant 0.000000e+00 : f32
    %67 = vector.broadcast %cst_23 : f32 to vector<1x8xf32>
    %68 = arith.cmpf one, %4, %67 : vector<1x8xf32>
    %69 = vector.broadcast %2 : vector<1x8xi32> to vector<8x8xi32>
    %70 = vector.broadcast %1 : vector<8x1xi32> to vector<8x8xi32>
    %71 = arith.cmpi slt, %69, %70 : vector<8x8xi32>
    %72 = vector.broadcast %2 : vector<1x8xi32> to vector<8x8xi32>
    %73 = vector.broadcast %1 : vector<8x1xi32> to vector<8x8xi32>
    %74 = arith.cmpi eq, %72, %73 : vector<8x8xi32>
    %cst_24 = arith.constant 0.000000e+00 : f32
    %75 = vector.broadcast %cst_24 : f32 to vector<8x1xf32>
    %76 = arith.cmpf oeq, %3, %75 : vector<8x1xf32>
    %77 = vector.broadcast %76 : vector<8x1xi1> to vector<8x8xi1>
    %78 = arith.andi %74, %77 : vector<8x8xi1>
    %79 = arith.ori %71, %78 : vector<8x8xi1>
    %80 = vector.broadcast %68 : vector<1x8xi1> to vector<8x8xi1>
    %81 = arith.andi %80, %79 : vector<8x8xi1>
    %82 = arith.extui %81 : vector<8x8xi1> to vector<8x8xi32>
    %83 = arith.sitofp %82 : vector<8x8xi32> to vector<8x8xf32>
    %84 = vector.broadcast %66 : vector<1x8xf32> to vector<8x8xf32>
    %85 = arith.subf %64, %84 : vector<8x8xf32>
    %cst_25 = arith.constant 1.000000e+01 : f32
    %86 = vector.broadcast %cst_25 : f32 to vector<8x8xf32>
    %87 = arith.mulf %85, %86 : vector<8x8xf32>
    %88 = math.exp %87 : vector<8x8xf32>
    %89 = arith.mulf %83, %88 : vector<8x8xf32>
    %90 = vector.shape_cast %89 : vector<8x8xf32> to vector<1x8x8xf32>
    %cst_26 = arith.constant dense<0.000000e+00> : vector<1xf32>
    %91 = vector.multi_reduction <add>, %90, %cst_26 [1, 2] : vector<1x8x8xf32> to vector<1xf32>
    %92 = vector.shape_cast %91 : vector<1xf32> to vector<1x1x1xf32>
    %93 = vector.extract %92[0, 0, 0] : f32 from vector<1x1x1xf32>
    %cst_27 = arith.constant 6.400000e+01 : f32
    %94 = arith.divf %93, %cst_27 : f32
    %cst_28 = arith.constant 5.000000e-01 : f32
    %95 = arith.mulf %cst_28, %60 : f32
    %cst_29 = arith.constant 5.000000e-01 : f32
    %96 = arith.mulf %cst_29, %94 : f32
    %97 = arith.addf %95, %96 : f32
    %c0_30 = arith.constant 0 : index
    %c0_31 = arith.constant 0 : index
    %98 = memref.load %arg5[%c0_30, %c0_31] : memref<1x1xf32, #tpu.memory_space<smem>>
    memref.store %97, %arg5[%c0_30, %c0_31] : memref<1x1xf32, #tpu.memory_space<smem>>
    return
  }
}

</mosaic_0001>

<bundles_post_ra>
// kernel: deephit_single_loss.1
= control target key start
LH: loop header
LB: loop body
LE: loop exit
PB: predicated region body
PF: predicated region fallthrough
CT: control target
= control target key end

     0   :  { %vm47_vm0 = vcmask 130048   ;;  %s490_s0 = inlined_call_operand.vmem [shape: f32[8,16], index: 0, kind: input, shape index: {}]   ;;  %s491_s1 = inlined_call_operand.vmem [shape: s32[8,1], index: 1, kind: input, shape index: {}]   ;;  %s492_s2 = inlined_call_operand.vmem [shape: s32[1,8], index: 2, kind: input, shape index: {}]   ;;  %s493_s3 = inlined_call_operand.vmem [shape: f32[8,1], index: 3, kind: input, shape index: {}]   ;;  %s494_s4 = inlined_call_operand.vmem [shape: f32[1,8], index: 4, kind: input, shape index: {}]   ;;  %s495_s5 = inlined_call_operand.hbm [shape: f32[1,1], index: 5, kind: output, shape index: {}]  }
   0x1   :  { %v21_v0 = vld [vmem:[%s490_s0] sm:$0xff] }
   0x2   :  { %v22_v1 = vld [vmem:[%s491_s1] sm:$0xff] }
   0x3   :  { %10 = vsyncpa [#allocation3], 0  ;;  %v48_v2 = vsel %vm47_vm0, %v21_v0, -inf  ;;  %v408_v3 = vmov 0   ;;  %v26_v4 = vlaneseq  ;;  %v409_v5 = vmov 0.0   ;;  %v24_v19 = vld [vmem:[%s493_s3] sm:$0xff] }
   0x4   :  { %386 = vset.pattern.permute.xlu1 %v408_v3  ;;  %387 = vset.pattern.permute.xlu0 %v408_v3  ;;  %vm410_vm1 = vmmov 0   ;;  %v411_v9 = vmov 1.0   ;;  %vm286_vm5 = vcmp.eq.f32.partialorder %v24_v19, 0.0  ;;  %v345_v21 = vld [vmem:[%s492_s2] ss:$0 sm:$0xff]  ;;  %v156_v41 = vsub.f32 1.0, %v24_v19 }
   0x5   :  { %49 = vmax.xlane.f32.xlu0 %v48_v2  ;;  %29 = vperm.xlu1 %386, %v22_v1   ;;  %v27_v6 = vand.u32 127, %v26_v4  ;;  %v454_v7 = vshrl.u32 %v26_v4, 7  ;;  %v287_v20 = vsel %vm286_vm5, 1, %v408_v3  ;;  %vm161_vm8 = vcmask 7168   ;;  %v25_v55 = vld [vmem:[%s494_s4] sm:$0x1] }
   0x6   :  { %363 = vmatprep.subr.mxu0 %v409_v5  ;;  %367 = vmatprep.mubr.msk.f32.mxu0 %vm410_vm1, %v409_v5  ;;  %vm283_vm9 = vcmp.ne.f32.partialorder %v25_v55, 0.0  ;;  %s412_s30 = smov [#allocation2]  }
   0x7   :  { %370 = vmatprep.subr.mxu1 %v409_v5  ;;  %374 = vmatprep.mubr.msk.f32.mxu1 %vm410_vm1, %v409_v5  ;;  %v36_v8 = vadd.s32 8, %v454_v7  ;;  %vm57_vm3 = vcmp.le.s32.totalorder %v454_v7, %v27_v6  ;;  %vm41_vm7 = vcmp.eq.s32.totalorder %v454_v7, %v345_v21  ;;  %v297_v52 = vsub.s32 0, %v454_v7 }
   0x8   :  { %v294_v60 = vsel %vm283_vm9, 1, %v408_v3  ;;  %vm312_vm1 = vcmask 64512  }
   0x9   :  { %vm58_vm2 = vcmp.le.s32.totalorder %v36_v8, %v27_v6  ;;  %vm42_vm6 = vcmp.eq.s32.totalorder %v36_v8, %v345_v21  ;;  %v298_v61 = vrot.slane %v294_v60, %v297_v52 }
   0xa   :  { %364 = vmatpush3.msk.msra.mxu0 %vm58_vm2, %v411_v9  ;;  %371 = vmatpush3.msk.msra.mxu1 %vm42_vm6, %v411_v9 }
   0xb   :  { %365 = vmatprep.subr.mxu0 %v409_v5  ;;  %372 = vmatprep.subr.mxu1 %v409_v5  ;;  %vm299_vm15 = vcmp.eq.s32.totalorder %v298_v61, 1 }
   0xc   :  { %366 = vmatpush3.msk.msra.mxu0 %vm57_vm3, %v411_v9  ;;  %373 = vmatpush3.msk.msra.mxu1 %vm41_vm7, %v411_v9 }
  0x80   :  { %v461_v13 = vpop.permute.xlu1 %29 }
  0x81   :  { %vm31_vm4 = vcmp.eq.s32.totalorder %v27_v6, %v461_v13  ;;  %vm285_vm10 = vcmp.eq.s32.totalorder %v345_v21, %v461_v13  ;;  %vm284_vm12 = vcmp.lt.s32.totalorder %v345_v21, %v461_v13 }
  0x82   :  { %v344_v14 = vsel %vm31_vm4, 1.0, %v409_v5 }
  0x83   :  { %v136_v15 = vmul.f32 %v344_v14, %v21_v0 }
  0x85   :  { %v137_v18 = vsel %vm47_vm0, %v136_v15, 0.0 }
  0x8e   :  { %v50_v10 = vpop.xlane.xlu0 %49 }
  0x8f   :  { %v51_v11 = vsub.f32 %v21_v0, %v50_v10 }
  0x91   :  { %v52_v12 = vmul.f32 1.442695, %v51_v11 }
  0x93   :  { %388 = vpow2.f32 %v52_v12 }
  0xa0   :  { %v389_v16 = vpop.eup %388 }
  0xa1   :  { %368 = vmatmul.mubr.msk.f32.vlgmr.msra.gmra.mxu0 %vm47_vm0, %v389_v16  ;;  %v54_v17 = vsel %vm47_vm0, %v389_v16, 0.0 }
  0xa2   :  { %55 = vadd.xlane.f32.xlu0 %v54_v17 }
  0xa6   :  { %138 = vadd.xlane.f32.xlu0 %v137_v18 }
  0xbc   :  { %289 = vperm.xlu0 %387, %v287_v20  }
 0x12b   :  { %v56_v22 = vpop.xlane.xlu0 %55 }
 0x12c   :  { %390 = vrcp.f32 %v56_v22  ;;  %v146_v29 = vmax.f32 %v56_v22, 0.0 }
 0x12e   :  { %v147_v30 = vadd.f32 1e-07, %v146_v29 }
 0x12f   :  { %v139_v37 = vpop.xlane.xlu0 %138 }
 0x130   :  { %392 = vlog2.f32 %v147_v30  ;;  %v144_v39 = vsub.f32 %v139_v37, %v50_v10 }
 0x132   :  { %v145_v43 = vmul.f32 %v144_v39, %v24_v19 }
 0x137   :  { %v290_v58 = vpop.permute.xlu0 %289 }
 0x138   :  { %vm291_vm11 = vcmp.eq.s32.totalorder %v290_v58, 1 }
 0x139   :  { %v391_v23 = vpop.eup %390  ;;  %vm292_vm13 = vmand %vm285_vm10, %vm291_vm11 }
 0x13a   :  { %vm293_vm14 = vmor %vm284_vm12, %vm292_vm13 }
 0x13d   :  { %v393_v36 = vpop.eup %392 }
 0x13e   :  { %v149_v38 = vmul.f32 0.6931472, %v393_v36 }
 0x140   :  { %v150_v40 = vsub.f32 0.0, %v149_v38 }
 0x142   :  { %v158_v45 = vadd.f32 %v150_v40, %v145_v43 }
 0x161   :  { %v132_v24 = vpop.f32.mrf.mxu0 }
 0x162   :  { %v140_v25 = vmul.f32 %v344_v14, %v132_v24  ;;  %v176_v26 = vmul.f32 %v391_v23, %v132_v24 }
 0x163   :  { %v369_v27 = vpop.f32.mrf.mxu0 }
 0x164   :  { %375 = vmatmul.mubr.msk.f32.vlgmr.msra.gmra.mxu1 %vm47_vm0, %v176_v26  ;;  %v141_v28 = vsel %vm47_vm0, %v140_v25, 0.0  ;;  %vm300_vm0 = vmand %vm299_vm15, %vm293_vm14 }
 0x165   :  { %142 = vadd.xlane.f32.xlu1 %v141_v28  ;;  %v356_v63 = vsel %vm300_vm0, 1.0, %v409_v5 }
 0x1ee   :  { %v143_v31 = vpop.xlane.xlu1 %142 }
 0x1ef   :  { %v151_v32 = vsub.f32 %v56_v22, %v143_v31  ;;  %v250_v33 = vmul.f32 %v391_v23, %v143_v31 }
 0x1f1   :  { %v152_v34 = vmax.f32 %v151_v32, 0.0  ;;  %251 = vxpose.xlu1.b32.start.end [1/1] (short) (narrow) %v250_v33, 8 }
 0x1f3   :  { %v153_v35 = vadd.f32 1e-07, %v152_v34 }
 0x1f5   :  { %394 = vlog2.f32 %v153_v35 }
 0x202   :  { %v395_v42 = vpop.eup %394 }
 0x203   :  { %v155_v44 = vmul.f32 0.6931472, %v395_v42 }
 0x205   :  { %v157_v46 = vmul.f32 %v156_v41, %v155_v44 }
 0x207   :  { %v159_v47 = vadd.f32 %v158_v45, %v157_v46 }
 0x209   :  { %v160_v48 = vsub.f32 0.0, %v159_v47 }
 0x20b   :  { %v162_v49 = vsel %vm161_vm8, %v160_v48, 0.0 }
 0x20c   :  { %163 = vadd.xlane.f32.xlu0 %v162_v49 }
 0x224   :  { %v246_v50 = vpop.f32.mrf.mxu1 }
 0x226   :  { %v376_v51 = vpop.f32.mrf.mxu1 }
 0x26d   :  { %v267_v53 = vpop.trf.xlu1 }
 0x26e   :  { %v306_v54 = vrot.slane %v267_v53, %v297_v52 }
 0x270   :  { %v307_v56 = vsub.f32 %v246_v50, %v306_v54 }
 0x272   :  { %v308_v57 = vmul.f32 10.0, %v307_v56 }
 0x274   :  { %v309_v59 = vmul.f32 1.442695, %v308_v57 }
 0x276   :  { %396 = vpow2.f32 %v309_v59 }
 0x283   :  { %v397_v62 = vpop.eup %396 }
 0x284   :  { %v311_v0 = vmul.f32 %v397_v62, %v356_v63 }
 0x286   :  { %v313_v1 = vsel %vm312_vm1, %v311_v0, 0.0 }
 0x287   :  { %314 = vadd.xlane.f32.xlu0 %v313_v1 }
 0x295   :  { %v164_v2 = vpop.xlane.xlu0 %163 }
 0x296   :  { %v165_v3 = vrot.slane %v164_v2, 4 }
 0x298   :  { %v166_v4 = vadd.f32 %v165_v3, %v164_v2 }
 0x29a   :  { %v167_v6 = vrot.slane %v166_v4, 2 }
 0x29c   :  { %v168_v7 = vadd.f32 %v167_v6, %v166_v4 }
 0x29e   :  { %v169_v8 = vrot.slane %v168_v7, 1 }
 0x2a0   :  { %v170_v9 = vadd.f32 %v169_v8, %v168_v7 }
 0x2a2   :  { %377 = vpush %v170_v9 }
 0x2d3   :  { %s378_s4 = spop %377 }
 0x2d4   :  { %s174_s24 = smul.f32 0.125, %s378_s4 }
 0x2d6   :  { %s326_s27 = smul.f32 0.5, %s174_s24 }
 0x310   :  { %v315_v10 = vpop.xlane.xlu0 %314 }
 0x311   :  { %v316_v11 = vrot.slane %v315_v10, 4 }
 0x313   :  { %v317_v12 = vadd.f32 %v316_v11, %v315_v10 }
 0x315   :  { %v318_v13 = vrot.slane %v317_v12, 2 }
 0x317   :  { %v319_v14 = vadd.f32 %v318_v13, %v317_v12 }
 0x319   :  { %v320_v15 = vrot.slane %v319_v14, 1 }
 0x31b   :  { %v321_v16 = vadd.f32 %v320_v15, %v319_v14 }
 0x31d   :  { %379 = vpush %v321_v16 }
 0x34e   :  { %s380_s25 = spop %379 }
 0x34f   :  { %s325_s26 = smul.f32 0.015625, %s380_s25 }
 0x351   :  { %s327_s28 = smul.f32 0.5, %s325_s26 }
 0x353   :  { %s328_s29 = sadd.f32 %s327_s28, %s326_s27 }
 0x355   :  { %330 = sst [smem:[#allocation2]] %s328_s29 }
 0x356   :  { %338 = dma.smem_to_hbm %s412_s30, 16, %s495_s5, [#allocation3]  }
 0x357   :  { %406 = dma.done.wait [#allocation3], 16  }
 0x358   :  { %407 = vsyncadd [#allocation3], 4294967280 }
 0x359   :  { %342 = sfence }
 0x35a   :  { %343 = vsyncpa [#allocation3], 1 }

</bundles_post_ra>
